<compile_context>
chip_gen: v5e
topology: v5e:2x2
jax: 0.10.0
libtpu: 0.0.40
codegen_flags: <defaults>
</compile_context>

<pallas_src>
import math

import jax
import jax.numpy as jnp
import numpy as np
from jax import lax
from jax.experimental import pallas as pl
from jax.experimental.pallas import tpu as pltpu

# ---------------- configuration ----------------
B = 2                   # batch
N = 128                 # query points per sample
NUM_BRANCH_INPUTS = 16
NUM_BASIS = 32
NUM_TRUNK_INPUTS = 2
BRANCH_HIDDEN = [32, 32]
TRUNK_HIDDEN = [32, 32]
LATENT_DIM = 16

BRANCH_DIMS_FULL = [NUM_BRANCH_INPUTS] + BRANCH_HIDDEN + [NUM_BASIS]   # [16, 32, 32, 32]
TRUNK_DIMS_FULL = [NUM_TRUNK_INPUTS] + TRUNK_HIDDEN + [NUM_BASIS]      # [2, 32, 32, 32]
NUM_BRANCH_LINEARS = len(BRANCH_DIMS_FULL) - 1                         # 3
NUM_TRUNK_LINEARS = len(TRUNK_DIMS_FULL) - 1                           # 3

# Modulator: nn.Linear(latent_dim, sum(trunk_dims_full[1:])) = Linear(16, 96)
MOD_DIM = sum(TRUNK_DIMS_FULL[1:])                                     # 96

# Modulation slice offsets exactly as in the PyTorch forward:
#   start = sum(self.trunk_dims[1 : lin_idx + 1]) with self.trunk_dims == TRUNK_HIDDEN
# (reproduces the module's overlapping-slice behavior: layer 2 reuses mod[32:64])
MOD_OFFSETS = [sum(TRUNK_HIDDEN[1:i + 1]) for i in range(NUM_TRUNK_LINEARS)]   # [0, 32, 32]
MOD_USED = max(MOD_OFFSETS[i] + TRUNK_DIMS_FULL[i + 1]
               for i in range(NUM_TRUNK_LINEARS))                      # 64 (cols 64:96 dead)

TRUNK_IN_DIM = LATENT_DIM + NUM_TRUNK_INPUTS                           # 18
OUT_SCALE = 1.0 / math.sqrt(NUM_BASIS)
LANES = 128

# The fused-weight slab layout below assumes this exact configuration.
assert TRUNK_DIMS_FULL[1:] == [NUM_BASIS] * NUM_TRUNK_LINEARS
assert BRANCH_DIMS_FULL[1:] == [NUM_BASIS] * NUM_BRANCH_LINEARS
assert MOD_OFFSETS[0] == 0 and all(o == NUM_BASIS for o in MOD_OFFSETS[1:])
assert MOD_USED == 2 * NUM_BASIS

# ---------------- compact packed weight slab: [64, 128] f32 (32 KB, single DMA) ----------------
# cols  0:18  rows 0:64  : fused weight  (Wm^T everywhere; trunk-0 W^T in rows 0:32, cols 16:18)
# col   18    rows 0:64  : fused bias    (bm[0:32]+b0  |  bm[32:64])
# cols 24:56  rows 0:32  : trunk-1 W^T ;  col 56 = b1   (column form for lane broadcast)
# cols 24:56  rows 32:64 : trunk-2 W^T ;  col 56 = b2
# cols 64:96  rows 0:32  : branch W1 (row form)
# cols 64:96  rows 32:64 : branch W2 * OUT_SCALE
# cols 96:128 rows 0:16  : branch W0
# cols 96:128 rows 16/17/18 : branch b0 / b1 / b2 * OUT_SCALE
SLAB_ROWS = 64
C_FUSED_B = TRUNK_IN_DIM                  # 18
C_TRUNK = 24
C_TRUNK_B = C_TRUNK + NUM_BASIS           # 56
C_BRANCH_W12 = 64
C_BRANCH_W0 = 96
R_BRANCH_BIAS = 16


# ---------------- kernel ----------------
def deeponet_kernel(branch_ref, trunk_ref, slab_ref, out_ref):
    # branch_ref: [1, 1, 16]  trunk_ref: [1, N, 18]  slab_ref: [64, 128]  out_ref: [1, 1, N]
    trunk = trunk_ref[0]                                             # [N, 18] = (latent | coords)

    # ---- fused modulator + trunk layer-0 (+ folded biases): a single MXU push ----
    # rows 0:32 -> pre-activation of trunk layer 0 WITH mod[0:32] already added
    # rows 32:64 -> mod[32:64] (used by trunk layers 1 and 2)
    w_fused = slab_ref[0:2 * NUM_BASIS, 0:TRUNK_IN_DIM]              # [64, 18]
    b_fused = slab_ref[0:2 * NUM_BASIS, C_FUSED_B:C_FUSED_B + 1]     # [64, 1]
    fused = lax.dot_general(w_fused, trunk, (((1,), (1,)), ((), ())),
                            preferred_element_type=jnp.float32) + b_fused    # [64, N]
    t = jnp.maximum(fused[0:NUM_BASIS, :], 0.0)                      # trunk layer-0 out [32, N]
    mod_u = fused[NUM_BASIS:2 * NUM_BASIS, :]                        # mod[32:64]        [32, N]

    # ---- trunk layers 1..2 (lane-dense [feature, N]) ----
    for i in range(1, NUM_TRUNK_LINEARS):
        r0 = (i - 1) * NUM_BASIS
        w_t = slab_ref[r0:r0 + NUM_BASIS, C_TRUNK:C_TRUNK + NUM_BASIS]        # [32, 32] = W^T
        b_c = slab_ref[r0:r0 + NUM_BASIS, C_TRUNK_B:C_TRUNK_B + 1]            # [32, 1]
        t = jnp.maximum(
            jnp.dot(w_t, t, preferred_element_type=jnp.float32) + b_c + mod_u, 0.0)

    # ---- branch MLP (OUT_SCALE pre-folded into the last linear host-side) ----
    x = branch_ref[0]                                                # [1, 16]
    w0 = slab_ref[0:NUM_BRANCH_INPUTS, C_BRANCH_W0:C_BRANCH_W0 + NUM_BASIS]   # [16, 32]
    w1 = slab_ref[0:NUM_BASIS, C_BRANCH_W12:C_BRANCH_W12 + NUM_BASIS]         # [32, 32]
    w2 = slab_ref[NUM_BASIS:2 * NUM_BASIS, C_BRANCH_W12:C_BRANCH_W12 + NUM_BASIS]
    b0 = slab_ref[R_BRANCH_BIAS + 0:R_BRANCH_BIAS + 1, C_BRANCH_W0:C_BRANCH_W0 + NUM_BASIS]
    b1 = slab_ref[R_BRANCH_BIAS + 1:R_BRANCH_BIAS + 2, C_BRANCH_W0:C_BRANCH_W0 + NUM_BASIS]
    b2 = slab_ref[R_BRANCH_BIAS + 2:R_BRANCH_BIAS + 3, C_BRANCH_W0:C_BRANCH_W0 + NUM_BASIS]
    x = jnp.maximum(jnp.dot(x, w0, preferred_element_type=jnp.float32) + b0, 0.0)
    x = jnp.maximum(jnp.dot(x, w1, preferred_element_type=jnp.float32) + b1, 0.0)
    x = jnp.maximum(jnp.dot(x, w2, preferred_element_type=jnp.float32) + b2, 0.0)   # [1, 32]

    # ---- final basis reduction: lane-dense [1, N] unmasked store ----
    out_ref[0] = jnp.dot(x, t, preferred_element_type=jnp.float32)   # [1, N]


# ---------------- wrapper ----------------
@jax.jit
def deeponet_forward(branch_in, trunk_in, slab):
    return pl.pallas_call(
        deeponet_kernel,
        out_shape=jax.ShapeDtypeStruct((B, 1, N), jnp.float32),
        grid=(B,),
        in_specs=[
            pl.BlockSpec((1, 1, NUM_BRANCH_INPUTS), lambda b: (b, 0, 0)),
            pl.BlockSpec((1, N, TRUNK_IN_DIM), lambda b: (b, 0, 0)),
            pl.BlockSpec((SLAB_ROWS, LANES), lambda b: (0, 0)),   # constant block -> resident, 1 DMA
        ],
        out_specs=pl.BlockSpec((1, 1, N), lambda b: (b, 0, 0)),
        compiler_params=pltpu.CompilerParams(dimension_semantics=("parallel",)),
    )(branch_in, trunk_in, slab)


# ---------------- deterministic parameter init ----------------
def init_linear(key, in_dim, out_dim):
    k1, k2 = jax.random.split(key)
    bound = 1.0 / math.sqrt(in_dim)
    w = jax.random.uniform(k1, (in_dim, out_dim), jnp.float32, -bound, bound)
    b = jax.random.uniform(k2, (1, out_dim), jnp.float32, -bound, bound)
    return w, b


def make_params(key):
    keys = jax.random.split(key, 1 + NUM_BRANCH_LINEARS + NUM_TRUNK_LINEARS)
    wm, bm = init_linear(keys[0], LATENT_DIM, MOD_DIM)
    branch_params = [
        init_linear(keys[1 + i], BRANCH_DIMS_FULL[i], BRANCH_DIMS_FULL[i + 1])
        for i in range(NUM_BRANCH_LINEARS)
    ]
    trunk_params = [
        init_linear(keys[1 + NUM_BRANCH_LINEARS + i], TRUNK_DIMS_FULL[i], TRUNK_DIMS_FULL[i + 1])
        for i in range(NUM_TRUNK_LINEARS)
    ]
    return wm, bm, branch_params, trunk_params


def pack_params(params):
    """One-time host-side fusion + packing into a compact [64, 128] f32 slab."""
    wm, bm, branch_params, trunk_params = params
    slab = np.zeros((SLAB_ROWS, LANES), np.float32)

    # --- fused modulator + trunk layer-0 block ---
    w0, b0 = trunk_params[0]                               # [2, 32], [1, 32]
    wm_used = np.asarray(wm)[:, :MOD_USED]                 # [16, 64] (cols 64:96 are dead weight)
    bm_used = np.asarray(bm)[0, :MOD_USED].copy()          # [64]
    fused_w = np.zeros((2 * NUM_BASIS, TRUNK_IN_DIM), np.float32)
    fused_w[:, :LATENT_DIM] = wm_used.T                    # Wm^T over the latent columns
    fused_w[:NUM_BASIS, LATENT_DIM:] = np.asarray(w0).T    # trunk-0 W^T over the coord columns
    fused_b = bm_used
    fused_b[:NUM_BASIS] += np.asarray(b0)[0]               # fold b0 + bm[0:32]
    slab[0:2 * NUM_BASIS, 0:TRUNK_IN_DIM] = fused_w
    slab[0:2 * NUM_BASIS, C_FUSED_B] = fused_b

    # --- trunk layers 1..2: W^T + bias column ---
    for i in range(1, NUM_TRUNK_LINEARS):
        w, bias = trunk_params[i]                          # [32, 32], [1, 32]
        r0 = (i - 1) * NUM_BASIS
        slab[r0:r0 + NUM_BASIS, C_TRUNK:C_TRUNK + NUM_BASIS] = np.asarray(w).T
        slab[r0:r0 + NUM_BASIS, C_TRUNK_B] = np.asarray(bias)[0]

    # --- branch linears (row form); OUT_SCALE folded into the last one ---
    bw0, bb0 = branch_params[0]
    bw1, bb1 = branch_params[1]
    bw2, bb2 = branch_params[2]
    slab[0:NUM_BRANCH_INPUTS, C_BRANCH_W0:C_BRANCH_W0 + NUM_BASIS] = np.asarray(bw0)
    slab[0:NUM_BASIS, C_BRANCH_W12:C_BRANCH_W12 + NUM_BASIS] = np.asarray(bw1)
    slab[NUM_BASIS:2 * NUM_BASIS, C_BRANCH_W12:C_BRANCH_W12 + NUM_BASIS] = (
        np.asarray(bw2) * OUT_SCALE)
    slab[R_BRANCH_BIAS + 0, C_BRANCH_W0:C_BRANCH_W0 + NUM_BASIS] = np.asarray(bb0)[0]
    slab[R_BRANCH_BIAS + 1, C_BRANCH_W0:C_BRANCH_W0 + NUM_BASIS] = np.asarray(bb1)[0]
    slab[R_BRANCH_BIAS + 2, C_BRANCH_W0:C_BRANCH_W0 + NUM_BASIS] = np.asarray(bb2)[0] * OUT_SCALE

    return jnp.asarray(slab)


# ---------------- pure-JAX reference (mirrors the PyTorch forward, unfused weights) ----------------
def reference_forward(branch_in, trunk_in, params):
    wm, bm, branch_params, trunk_params = params
    coords = trunk_in[:, :, -NUM_TRUNK_INPUTS:]
    latent = trunk_in[:, :, :-NUM_TRUNK_INPUTS]
    mod = latent @ wm + bm

    x = branch_in
    for w, bias in branch_params:
        x = jnp.maximum(x @ w + bias, 0.0)

    t = coords
    for i, (w, bias) in enumerate(trunk_params):
        t = t @ w + bias
        off = MOD_OFFSETS[i]
        t = t + mod[:, :, off:off + w.shape[-1]]
        t = jnp.maximum(t, 0.0)

    out = jnp.sum(x * t, axis=-1) / math.sqrt(NUM_BASIS)
    return out[:, None, :]


if __name__ == "__main__":
    key = jax.random.PRNGKey(0)
    k_branch, k_trunk, k_params = jax.random.split(key, 3)

    branch_input = jax.random.normal(k_branch, (B, 1, NUM_BRANCH_INPUTS), jnp.float32)
    trunk_input = jax.random.normal(k_trunk, (B, N, TRUNK_IN_DIM), jnp.float32)
    params = make_params(k_params)
    slab = pack_params(params)            # one-time host-side weight fusion / packing

    out = deeponet_forward(branch_input, trunk_input, slab)
    out = jax.block_until_ready(out)

    with jax.default_matmul_precision("highest"):
        ref = reference_forward(branch_input, trunk_input, params)
    ref = jax.block_until_ready(ref)

    assert out.shape == (B, 1, N), out.shape
    np.testing.assert_allclose(np.asarray(out), np.asarray(ref), rtol=2e-2, atol=2e-2)

    print("KERNEL_OK")
</pallas_src>

<mosaic_0001>
module attributes {stable_mosaic.version = 11 : i64} {
  func.func @deeponet_kernel(%arg0: i32, %arg1: memref<1x1x16xf32, #tpu.memory_space<vmem>>, %arg2: memref<1x128x18xf32, #tpu.memory_space<vmem>>, %arg3: memref<64x128xf32, #tpu.memory_space<vmem>>, %arg4: memref<1x1x128xf32, #tpu.memory_space<vmem>>) attributes {dimension_semantics = [#tpu.dimension_semantics<parallel>], iteration_bounds = array<i64: 2>, scalar_prefetch = 0 : i64, scratch_operands = 0 : i64, tpu.core_type = #tpu.core_type<tc>, window_params = [{transform_indices = @transform_0, window_bounds = array<i64: 1, 1, 16>}, {transform_indices = @transform_1, window_bounds = array<i64: 1, 128, 18>}, {pipeline_mode = #tpu.pipeline_mode<synchronous>, transform_indices = @transform_2, window_bounds = array<i64: 64, 128>}, {transform_indices = @transform_3, window_bounds = array<i64: 1, 1, 128>}]} {
    %c0 = arith.constant 0 : index
    %c0_0 = arith.constant 0 : index
    %c0_1 = arith.constant 0 : index
    %0 = vector.load %arg2[%c0, %c0_0, %c0_1] : memref<1x128x18xf32, #tpu.memory_space<vmem>>, vector<1x128x18xf32>
    %1 = vector.shape_cast %0 : vector<1x128x18xf32> to vector<128x18xf32>
    %c0_2 = arith.constant 0 : index
    %c0_3 = arith.constant 0 : index
    %2 = vector.load %arg3[%c0_2, %c0_3] : memref<64x128xf32, #tpu.memory_space<vmem>>, vector<64x18xf32>
    %c0_4 = arith.constant 0 : index
    %c18 = arith.constant 18 : index
    %3 = vector.load %arg3[%c0_4, %c18] : memref<64x128xf32, #tpu.memory_space<vmem>>, vector<64x1xf32>
    %cst = arith.constant dense<0.000000e+00> : vector<64x128xf32>
    %4 = tpu.matmul %2, %1, %cst {dimension_numbers = #tpu.dot_dimension_numbers<[1], [1], [0], [0], [0, 0, 1, 0], [], []>} : vector<64x18xf32>, vector<128x18xf32>, vector<64x128xf32> -> vector<64x128xf32>
    %5 = vector.broadcast %3 : vector<64x1xf32> to vector<64x128xf32>
    %6 = arith.addf %4, %5 : vector<64x128xf32>
    %7 = vector.extract_strided_slice %6 {offsets = [0, 0], sizes = [32, 128], strides = [1, 1]} : vector<64x128xf32> to vector<32x128xf32>
    %cst_5 = arith.constant 0.000000e+00 : f32
    %8 = vector.broadcast %cst_5 : f32 to vector<32x128xf32>
    %9 = arith.maximumf %7, %8 : vector<32x128xf32>
    %10 = vector.extract_strided_slice %6 {offsets = [32, 0], sizes = [32, 128], strides = [1, 1]} : vector<64x128xf32> to vector<32x128xf32>
    %c0_6 = arith.constant 0 : index
    %c24 = arith.constant 24 : index
    %11 = vector.load %arg3[%c0_6, %c24] : memref<64x128xf32, #tpu.memory_space<vmem>>, vector<32x32xf32>
    %c0_7 = arith.constant 0 : index
    %c56 = arith.constant 56 : index
    %12 = vector.load %arg3[%c0_7, %c56] : memref<64x128xf32, #tpu.memory_space<vmem>>, vector<32x1xf32>
    %cst_8 = arith.constant dense<0.000000e+00> : vector<32x128xf32>
    %13 = tpu.matmul %11, %9, %cst_8 {dimension_numbers = #tpu.dot_dimension_numbers<[1], [0], [0], [1], [0, 0, 1, 1], [], []>} : vector<32x32xf32>, vector<32x128xf32>, vector<32x128xf32> -> vector<32x128xf32>
    %14 = vector.broadcast %12 : vector<32x1xf32> to vector<32x128xf32>
    %15 = arith.addf %13, %14 : vector<32x128xf32>
    %16 = arith.addf %15, %10 : vector<32x128xf32>
    %cst_9 = arith.constant 0.000000e+00 : f32
    %17 = vector.broadcast %cst_9 : f32 to vector<32x128xf32>
    %18 = arith.maximumf %16, %17 : vector<32x128xf32>
    %c32 = arith.constant 32 : index
    %c24_10 = arith.constant 24 : index
    %19 = vector.load %arg3[%c32, %c24_10] : memref<64x128xf32, #tpu.memory_space<vmem>>, vector<32x32xf32>
    %c32_11 = arith.constant 32 : index
    %c56_12 = arith.constant 56 : index
    %20 = vector.load %arg3[%c32_11, %c56_12] : memref<64x128xf32, #tpu.memory_space<vmem>>, vector<32x1xf32>
    %cst_13 = arith.constant dense<0.000000e+00> : vector<32x128xf32>
    %21 = tpu.matmul %19, %18, %cst_13 {dimension_numbers = #tpu.dot_dimension_numbers<[1], [0], [0], [1], [0, 0, 1, 1], [], []>} : vector<32x32xf32>, vector<32x128xf32>, vector<32x128xf32> -> vector<32x128xf32>
    %22 = vector.broadcast %20 : vector<32x1xf32> to vector<32x128xf32>
    %23 = arith.addf %21, %22 : vector<32x128xf32>
    %24 = arith.addf %23, %10 : vector<32x128xf32>
    %cst_14 = arith.constant 0.000000e+00 : f32
    %25 = vector.broadcast %cst_14 : f32 to vector<32x128xf32>
    %26 = arith.maximumf %24, %25 : vector<32x128xf32>
    %c0_15 = arith.constant 0 : index
    %c0_16 = arith.constant 0 : index
    %c0_17 = arith.constant 0 : index
    %27 = vector.load %arg1[%c0_15, %c0_16, %c0_17] : memref<1x1x16xf32, #tpu.memory_space<vmem>>, vector<1x1x16xf32>
    %28 = vector.shape_cast %27 : vector<1x1x16xf32> to vector<1x16xf32>
    %c0_18 = arith.constant 0 : index
    %c96 = arith.constant 96 : index
    %29 = vector.load %arg3[%c0_18, %c96] : memref<64x128xf32, #tpu.memory_space<vmem>>, vector<16x32xf32>
    %c0_19 = arith.constant 0 : index
    %c64 = arith.constant 64 : index
    %30 = vector.load %arg3[%c0_19, %c64] : memref<64x128xf32, #tpu.memory_space<vmem>>, vector<32x32xf32>
    %c32_20 = arith.constant 32 : index
    %c64_21 = arith.constant 64 : index
    %31 = vector.load %arg3[%c32_20, %c64_21] : memref<64x128xf32, #tpu.memory_space<vmem>>, vector<32x32xf32>
    %c16 = arith.constant 16 : index
    %c96_22 = arith.constant 96 : index
    %32 = vector.load %arg3[%c16, %c96_22] : memref<64x128xf32, #tpu.memory_space<vmem>>, vector<1x32xf32>
    %c17 = arith.constant 17 : index
    %c96_23 = arith.constant 96 : index
    %33 = vector.load %arg3[%c17, %c96_23] : memref<64x128xf32, #tpu.memory_space<vmem>>, vector<1x32xf32>
    %c18_24 = arith.constant 18 : index
    %c96_25 = arith.constant 96 : index
    %34 = vector.load %arg3[%c18_24, %c96_25] : memref<64x128xf32, #tpu.memory_space<vmem>>, vector<1x32xf32>
    %cst_26 = arith.constant dense<0.000000e+00> : vector<1x32xf32>
    %35 = tpu.matmul %28, %29, %cst_26 {dimension_numbers = #tpu.dot_dimension_numbers<[1], [0], [0], [1], [0, 0, 1, 1], [], []>} : vector<1x16xf32>, vector<16x32xf32>, vector<1x32xf32> -> vector<1x32xf32>
    %36 = arith.addf %35, %32 : vector<1x32xf32>
    %cst_27 = arith.constant 0.000000e+00 : f32
    %37 = vector.broadcast %cst_27 : f32 to vector<1x32xf32>
    %38 = arith.maximumf %36, %37 : vector<1x32xf32>
    %cst_28 = arith.constant dense<0.000000e+00> : vector<1x32xf32>
    %39 = tpu.matmul %38, %30, %cst_28 {dimension_numbers = #tpu.dot_dimension_numbers<[1], [0], [0], [1], [0, 0, 1, 1], [], []>} : vector<1x32xf32>, vector<32x32xf32>, vector<1x32xf32> -> vector<1x32xf32>
    %40 = arith.addf %39, %33 : vector<1x32xf32>
    %cst_29 = arith.constant 0.000000e+00 : f32
    %41 = vector.broadcast %cst_29 : f32 to vector<1x32xf32>
    %42 = arith.maximumf %40, %41 : vector<1x32xf32>
    %cst_30 = arith.constant dense<0.000000e+00> : vector<1x32xf32>
    %43 = tpu.matmul %42, %31, %cst_30 {dimension_numbers = #tpu.dot_dimension_numbers<[1], [0], [0], [1], [0, 0, 1, 1], [], []>} : vector<1x32xf32>, vector<32x32xf32>, vector<1x32xf32> -> vector<1x32xf32>
    %44 = arith.addf %43, %34 : vector<1x32xf32>
    %cst_31 = arith.constant 0.000000e+00 : f32
    %45 = vector.broadcast %cst_31 : f32 to vector<1x32xf32>
    %46 = arith.maximumf %44, %45 : vector<1x32xf32>
    %cst_32 = arith.constant dense<0.000000e+00> : vector<1x128xf32>
    %47 = tpu.matmul %46, %26, %cst_32 {dimension_numbers = #tpu.dot_dimension_numbers<[1], [0], [0], [1], [0, 0, 1, 1], [], []>} : vector<1x32xf32>, vector<32x128xf32>, vector<1x128xf32> -> vector<1x128xf32>
    %c0_33 = arith.constant 0 : index
    %c0_34 = arith.constant 0 : index
    %c0_35 = arith.constant 0 : index
    %48 = vector.load %arg4[%c0_33, %c0_34, %c0_35] : memref<1x1x128xf32, #tpu.memory_space<vmem>>, vector<1x1x128xf32>
    %49 = vector.shape_cast %48 : vector<1x1x128xf32> to vector<1x128xf32>
    %50 = vector.shape_cast %47 : vector<1x128xf32> to vector<1x1x128xf32>
    tpu.vector_store %arg4[%c0_33, %c0_34, %c0_35], %50 {strides = array<i32>} : memref<1x1x128xf32, #tpu.memory_space<vmem>>, vector<1x1x128xf32>,
    return
  }
  func.func @transform_0(%arg0: i32) -> (i32, i32, i32) {
    %c0_i32 = arith.constant 0 : i32
    %c0_i32_0 = arith.constant 0 : i32
    %c0_i32_1 = arith.constant 0 : i32
    return %arg0, %c0_i32, %c0_i32_0 : i32, i32, i32
  }
  func.func @transform_1(%arg0: i32) -> (i32, i32, i32) {
    %c0_i32 = arith.constant 0 : i32
    %c0_i32_0 = arith.constant 0 : i32
    %c0_i32_1 = arith.constant 0 : i32
    return %arg0, %c0_i32, %c0_i32_0 : i32, i32, i32
  }
  func.func @transform_2(%arg0: i32) -> (i32, i32) {
    %c0_i32 = arith.constant 0 : i32
    %c0_i32_0 = arith.constant 0 : i32
    %c0_i32_1 = arith.constant 0 : i32
    return %c0_i32, %c0_i32_0 : i32, i32
  }
  func.func @transform_3(%arg0: i32) -> (i32, i32, i32) {
    %c0_i32 = arith.constant 0 : i32
    %c0_i32_0 = arith.constant 0 : i32
    %c0_i32_1 = arith.constant 0 : i32
    return %arg0, %c0_i32, %c0_i32_0 : i32, i32, i32
  }
}

</mosaic_0001>

<bundles_post_ra>
// kernel: deeponet_forward.1
= control target key start
LH: loop header
LB: loop body
LE: loop exit
PB: predicated region body
PF: predicated region fallthrough
CT: control target
= control target key end

     0   :  { %8 = vsyncpa [#allocation3], 0  ;;  %s1188_s0 = inlined_call_operand.vmem [shape: f32[2,1,16], index: 0, kind: input, shape index: {}]   ;;  %s1189_s1 = inlined_call_operand.vmem [shape: f32[2,128,18], index: 1, kind: input, shape index: {}]   ;;  %s1190_s2 = inlined_call_operand.vmem [shape: f32[64,128], index: 2, kind: input, shape index: {}]   ;;  %s1191_s3 = inlined_call_operand.hbm [shape: f32[2,1,128], index: 3, kind: output, shape index: {}]  }
   0x1   :  { %10 = vsyncpa [#allocation3 + $0x1], 0  ;;  %s940_s12 = smov 0   ;;  %s942_s13 = smov 0  }
   0x2   :  { %s944_s14 = smov 0   ;;  %s946_s15 = smov 0  }
   0x3 LB: > { %s961_s16 = sadd.s32 4294967295, %s913_s15   ;;  %s727_s17 = sadd.s32 4294967294, %s913_s15   ;;  %s913_s15 = sphi %s946_s15, %s1197_s15   ;;  %s909_s14 = sphi %s944_s14, %s1196_s14   ;;  %s905_s13 = sphi %s942_s13, %s1195_s13   ;;  %s901_s12 = sphi %s940_s12, %s1194_s12  }
   0x4   : > { %s965_s18 = sadd.s32 1, %s913_s15   ;;  %s96_s19 = sadd.s32 1, %s909_s14 }
   0x5   : > { %s93_s20 = ssub.s32 %s913_s15, %s965_s18  ;;  %p106_p0 = scmp.ne.s32.totalorder %s909_s14, %s905_s13 }
   0x6   : > { %p94_p1 = scmp.eq.s32.totalorder %s93_s20, 0  ;;  %p107_p2 = scmp.eq.s32.totalorder %s961_s16, 1 }
   0x7   : > { %p112_p3 = scmp.ne.s32.totalorder %s905_s13, %s901_s12  ;;  %p113_p4 = scmp.eq.s32.totalorder %s727_s17, 1 }
   0x8   : > { %s976_s21 = scalar_select %p94_p1, %s909_s14, %s96_s19  }
   0x9   : > { %p978_p5 = por %p107_p2, %p106_p0  ;;  %p982_p6 = por %p113_p4, %p112_p3 }
   0xa   : > { %p730_p7 = scmp.ge.s32.totalorder %s913_s15, 1  ;;  %p148_p8 = scmp.lt.s32.totalorder %s913_s15, 3 }
   0xc   : > { %p149_p9 = pnand %p730_p7, %p148_p8 }
   0xd   : > { %p174_p10 = scmp.lt.s32.totalorder (!%p149_p9), %s961_s16, 1  ;;  %s915_s29 = smov (!%p149_p9), 32  }
   0xe   : > { %152 = sbr.rel (%p149_p9) target bundleno = 715 (0x2cb), region = 32  ;;  %s917_s11 = smov (!%p149_p9), 104  }
   0xf   : > { %s918_s17 = smov (!%p149_p9), 64   ;;  %s659_s24 = scalar_lea.hbm (!%p149_p9), %s1191_s3, %s961_s16 }
  0x10   : > { %s663_s27 = sshll.u32 (!%p149_p9), %s659_s24, 4  ;;  %s871_s8 = scalar_lea.hbm (!%p149_p9), %s1191_s3, 2  ;;  %s664_s27 = int_to_ptr.hbm [resolvable:$true] %s663_s27 }
  0x11   : > { %s865_s4 = sshra.s32 (!%p149_p9), %s664_s27, 4  ;;  %s866_s4 = int_to_ptr.hbm [resolvable:$true] %s865_s4 }
  0x12   : > { %s867_s5 = scalar_lea.hbm (!%p149_p9), %s866_s4, 1  ;;  %p872_p0 = scmp.lt.s32.totalorder (!%p149_p9), %s866_s4, %s1191_s3 }
  0x13   : > { %v992_v0 = vld [vmem:[%s1190_s2] sm:$0xff]  ;;  %v997_v1 = vld [vmem:[%s1190_s2 + $0x8] sm:$0xff]  ;;  %s1002_s28 = scalar_select %p174_p10, %s961_s16, 1  ;;  %vm246_vm0 = vcmask 146432   ;;  %v1030_v11 = vld [vmem:[%s1190_s2 + $0x10] sm:$0xff]  ;;  %v916_v13 = vmov 18  }
  0x14   : > { %v816_v2 = vpack.i.bf16 %v992_v0, %v997_v1  ;;  %822 = vset.pattern.permute.xlu1 %v916_v13  ;;  %821 = vset.pattern.permute.xlu0 %v916_v13  ;;  %v201_v16 = vld [vmem:[%s1190_s2 + $0x18] sm:$0xff]  ;;  %v1078_v24 = vld [vmem:[%s1190_s2 + $0x30] sm:$0xff]  ;;  %v1089_v25 = vld [vmem:[%s1190_s2 + $0x20] sm:$0xff]  ;;  %vm521_vm1 = vcmask 130048   ;;  %v919_v34 = vmov 56   ;;  %vm388_vm2 = vcmask 261120   ;;  %p868_p11 = scmp.ne.s32.totalorder %s866_s4, %s867_s5  ;;  %p873_p1 = scmp.lt.s32.totalorder %s871_s8, %s867_s5 }
  0x15   : > { %s771_s30 = sshll.u32 %s1002_s28, 7  ;;  %218 = vperm.xlu1 %822, %v1030_v11   ;;  %823 = vset.pattern.permute.xlu2 %v916_v13  ;;  %v824_v20 = vpack.i.bf16 %v1030_v11, %v201_v16  ;;  %v1069_v23 = vld [vmem:[%s1190_s2 + $0x38] sm:$0xff]  ;;  %v1096_v26 = vld [vmem:[%s1190_s2 + $0x28] sm:$0xff]  ;;  %s176_s7 = scalar_lea.vmem %s1188_s0, %s1002_s28  ;;  %v506_v31 = vld [vmem:[%s1190_s2 + $0x10] sm:$0x1] }
  0x16   : > { %817 = vrot.lane.b32.xlu0 %v816_v2, %s915_s29  ;;  %s1009_s6 = scalar_lea.vmem %s1189_s1, %s771_s30  ;;  %208 = vperm.xlu2 %823, %v992_v0   ;;  %v503_v30 = vld [vmem:[%s176_s7] sm:$0x1]  ;;  %v507_v48 = vld [vmem:[%s1190_s2 + $0x11] sm:$0x1]  ;;  %v845_v59 = vpack.i.bf16 %v1089_v25, %v1096_v26  ;;  %v840_v60 = vpack.i.bf16 %v1078_v24, %v1069_v23  ;;  %p869_p12 = pnand %p868_p11, %p978_p5 }
  0x17   : > { %v197_v3 = vld [vmem:[%s1009_s6 + $0x78] sm:$0xff]  ;;  %v196_v4 = vld [vmem:[%s1009_s6 + $0x70] sm:$0xff]  ;;  %v195_v5 = vld [vmem:[%s1009_s6 + $0x68] sm:$0xff]  ;;  %p874_p2 = por %p873_p1, %p872_p0 }
  0x18   : > { %733 = vmatpush.xpose.msk.msra.mxu0 %vm246_vm0, %v197_v3  ;;  %v194_v6 = vld [vmem:[%s1009_s6 + $0x60] sm:$0xff]  ;;  %v193_v7 = vld [vmem:[%s1009_s6 + $0x58] sm:$0xff]  ;;  %v192_v8 = vld [vmem:[%s1009_s6 + $0x50] sm:$0xff]  ;;  %p870_p13 = pneg %p869_p12 }
  0x19   : > { %v191_v9 = vld [vmem:[%s1009_s6 + $0x48] sm:$0xff]  ;;  %v190_v10 = vld [vmem:[%s1009_s6 + $0x40] sm:$0xff]  ;;  %v189_v12 = vld [vmem:[%s1009_s6 + $0x38] sm:$0xff] }
  0x1a   : > { %v188_v14 = vld [vmem:[%s1009_s6 + $0x30] sm:$0xff]  ;;  %v187_v15 = vld [vmem:[%s1009_s6 + $0x28] sm:$0xff]  ;;  %v186_v17 = vld [vmem:[%s1009_s6 + $0x20] sm:$0xff]  ;;  %p875_p3 = pnand %p874_p2, %p870_p13 }
  0x1b   : > { %v185_v18 = vld [vmem:[%s1009_s6 + $0x18] sm:$0xff]  ;;  %v184_v19 = vld [vmem:[%s1009_s6 + $0x10] sm:$0xff]  ;;  %v183_v21 = vld [vmem:[%s1009_s6 + $0x8] sm:$0xff] }
  0x1c   : > { %734 = vmatpush.xpose.msk.msra.mxu0 %vm246_vm0, %v196_v4  ;;  %v182_v22 = vld [vmem:[%s1009_s6] sm:$0xff] }
  0x1d   : > { %213 = vperm.xlu1 %822, %v997_v1  }
  0x1e   : > { %380 = vrot.lane.b32.xlu2 %v992_v0, %s917_s11  ;;  %223 = vperm.xlu0 %821, %v201_v16  }
  0x1f   : > { %834 = vset.pattern.permute.xlu2 %v919_v34 }
  0x20   : > { %735 = vmatpush.xpose.msk.msra.mxu0 %vm246_vm0, %v195_v5 }
  0x24   : > { %736 = vmatpush.xpose.msk.msra.mxu0 %vm246_vm0, %v194_v6 }
  0x25   : > { %382 = vrot.lane.b32.xlu1 %v997_v1, %s917_s11 }
  0x26   : > { %384 = vrot.lane.b32.xlu2 %v1030_v11, %s917_s11  ;;  %386 = vrot.lane.b32.xlu0 %v201_v16, %s917_s11 }
  0x28   : > { %737 = vmatpush.xpose.msk.msra.mxu0 %vm246_vm0, %v193_v7 }
  0x2c   : > { %738 = vmatpush.xpose.msk.msra.mxu0 %vm246_vm0, %v192_v8 }
  0x2d   : > { %825 = vrot.lane.b32.xlu1 %v824_v20, %s918_s17 }
  0x2e   : > { %830 = vrot.lane.b32.xlu0 %v816_v2, %s918_s17  ;;  %518 = vrot.lane.b32.xlu2 %v506_v31, %s915_s29 }
  0x30   : > { %739 = vmatpush.xpose.msk.msra.mxu0 %vm246_vm0, %v191_v9 }
  0x34   : > { %740 = vmatpush.xpose.msk.msra.mxu0 %vm246_vm0, %v190_v10 }
  0x35   : > { %243 = vperm.xlu1 %822, %v1069_v23  }
  0x36   : > { %238 = vperm.xlu0 %821, %v1078_v24   ;;  %377 = vperm.xlu2 %834, %v201_v16  }
  0x38   : > { %741 = vmatpush.xpose.msk.msra.mxu0 %vm246_vm0, %v189_v12 }
  0x3c   : > { %742 = vmatpush.xpose.msk.msra.mxu0 %vm246_vm0, %v188_v14 }
  0x3d   : > { %835 = vset.pattern.permute.xlu1 %v919_v34 }
  0x3e   : > { %837 = vset.pattern.permute.xlu0 %v919_v34  ;;  %372 = vperm.xlu1 %835, %v1030_v11  }
  0x3f   : > { %367 = vperm.xlu0 %837, %v997_v1   ;;  %836 = vset.pattern.permute.xlu2 %v916_v13 }
  0x40   : > { %743 = vmatpush.xpose.msk.msra.mxu0 %vm246_vm0, %v187_v15  ;;  %233 = vperm.xlu2 %836, %v1096_v26  }
  0x44   : > { %744 = vmatpush.xpose.msk.msra.mxu0 %vm246_vm0, %v186_v17 }
  0x46   : > { %838 = vset.pattern.permute.xlu1 %v916_v13 }
  0x47   : > { %228 = vperm.xlu1 %838, %v1089_v25   ;;  %454 = vrot.lane.b32.xlu0 %v1078_v24, %s917_s11 }
  0x48   : > { %745 = vmatpush.xpose.msk.msra.mxu0 %vm246_vm0, %v185_v18  ;;  %839 = vset.pattern.permute.xlu2 %v919_v34 }
  0x49   : > { %362 = vperm.xlu2 %839, %v992_v0  }
  0x4c   : > { %746 = vmatpush.xpose.msk.msra.mxu0 %vm246_vm0, %v184_v19 }
  0x4f   : > { %450 = vrot.lane.b32.xlu1 %v1089_v25, %s917_s11  ;;  %559 = vrot.lane.b32.xlu0 %v507_v48, %s915_s29 }
  0x50   : > { %747 = vmatpush.xpose.msk.msra.mxu0 %vm246_vm0, %v183_v21  ;;  %850 = vset.pattern.permute.xlu1 %v919_v34 }
  0x51   : > { %452 = vrot.lane.b32.xlu2 %v1096_v26, %s917_s11 }
  0x54   : > { %748 = vmatpush.xpose.msk.msra.mxu0 %vm246_vm0, %v182_v22 }
  0x57   : > { %749 = vmatmul.msk.f32.vlgmr.msra.gmra.mxu0 %vm246_vm0, %v992_v0  ;;  %456 = vrot.lane.b32.xlu1 %v1069_v23, %s917_s11 }
  0x58   : > { %443 = vperm.xlu0 %837, %v1078_v24  }
  0x59   : > { %841 = vrot.lane.b32.xlu2 %v840_v60, %s918_s17 }
  0x5f   : > { %750 = vmatmul.msk.f32.gmra.mxu0 %vm246_vm0, %v997_v1  ;;  %846 = vrot.lane.b32.xlu1 %v845_v59, %s918_s17 }
  0x61   : > { %447 = vperm.xlu2 %839, %v1069_v23  }
  0x67   : > { %751 = vmatmul.msk.f32.gmra.mxu0 %vm246_vm0, %v1030_v11  ;;  %439 = vperm.xlu1 %850, %v1096_v26  }
  0x69   : > { %435 = vperm.xlu2 %839, %v1089_v25  }
  0x6f   : > { %752 = vmatmul.msk.f32.gmra.mxu0 %vm246_vm0, %v201_v16 }
  0x70   : > { %v209_v42 = vpop.permute.xlu2 %208 }
  0x77   : > { %753 = vmatmul.msk.f32.gmra.mxu0 %vm246_vm0, %v1089_v25 }
  0x78   : > { %v381_v58 = vpop.permute.xlu2 %380 }
  0x7f   : > { %754 = vmatmul.msk.f32.gmra.mxu0 %vm246_vm0, %v1096_v26 }
  0x80   : > { %v385_v61 = vpop.permute.xlu2 %384 }
  0x87   : > { %755 = vmatmul.msk.f32.gmra.mxu0 %vm246_vm0, %v1078_v24  ;;  %v219_v32 = vpop.permute.xlu1 %218 }
  0x88   : > { %v818_v27 = vpop.permute.xlu0 %817  ;;  %v519_v62 = vpop.permute.xlu2 %518 }
  0x89   : > { %v819_v28 = vunpack.i.l.bf16 %v818_v27  ;;  %v820_v29 = vunpack.i.h.bf16 %v818_v27 }
  0x8b   : > { %539 = vmatpush.msra.mxu3 %v819_v28 }
  0x8d   : > { %540 = vmatpush.msra.mxu3 %v820_v29 }
  0x8e   : > { %765 = vmatmul.msk.f32.vlgmr.msra.gmra.mxu3 %vm521_vm1, %v503_v30 }
  0x8f   : > { %756 = vmatmul.msk.f32.gmra.mxu0 %vm246_vm0, %v1069_v23  ;;  %v214_v35 = vpop.permute.xlu1 %213 }
  0x90   : > { %v224_v37 = vpop.permute.xlu0 %223  ;;  %v378_v2 = vpop.permute.xlu2 %377 }
  0x97   : > { %v383_v39 = vpop.permute.xlu1 %382 }
  0x98   : > { %v387_v40 = vpop.permute.xlu0 %386 }
  0x9a   : > { %v234_v3 = vpop.permute.xlu2 %233 }
  0x9f   : > { %v826_v46 = vpop.permute.xlu1 %825 }
  0xa0   : > { %v827_v49 = vunpack.i.l.bf16 %v826_v46  ;;  %v828_v50 = vunpack.i.h.bf16 %v826_v46  ;;  %v831_v52 = vpop.permute.xlu0 %830 }
  0xa1   : > { %v832_v54 = vunpack.i.l.bf16 %v831_v52  ;;  %v833_v56 = vunpack.i.h.bf16 %v831_v52 }
  0xa2   : > { %577 = vmatpush.msrb.mxu3 %v827_v49 }
  0xa3   : > { %v363_v4 = vpop.permute.xlu2 %362 }
  0xa4   : > { %578 = vmatpush.msrb.mxu3 %v828_v50 }
  0xa6   : > { %579 = vmatpush.msrb.mxu3 %v832_v54 }
  0xa7   : > { %v244_v9 = vpop.permute.xlu1 %243 }
  0xa8   : > { %580 = vmatpush.msrb.mxu3 %v833_v56  ;;  %v239_v14 = vpop.permute.xlu0 %238 }
  0xab   : > { %v453_v5 = vpop.permute.xlu2 %452 }
  0xb0   : > { %v373_v11 = vpop.permute.xlu1 %372 }
  0xb1   : > { %v368_v18 = vpop.permute.xlu0 %367 }
  0xb3   : > { %v842_v6 = vpop.permute.xlu2 %841 }
  0xb4   : > { %v844_v7 = vunpack.i.h.bf16 %v842_v6  ;;  %v843_v8 = vunpack.i.l.bf16 %v842_v6 }
  0xb6   : > { %617 = vmatpush.msra.mxu3 %v843_v8 }
  0xb8   : > { %618 = vmatpush.msra.mxu3 %v844_v7 }
  0xb9   : > { %v229_v15 = vpop.permute.xlu1 %228  ;;  %v455_v25 = vpop.permute.xlu0 %454 }
  0xc1   : > { %v451_v19 = vpop.permute.xlu1 %450 }
  0xc9   : > { %v457_v22 = vpop.permute.xlu1 %456 }
  0xd4   : > { %v328_v33 = vpop.f32.mrf.mxu0 }
  0xd5   : > { %v329_v51 = vadd.f32 %v328_v33, %v209_v42 }
  0xd7   : > { %v352_v57 = vmax.f32 %v329_v51, 0.0  ;;  %v448_v51 = vpop.permute.xlu2 %447 }
  0xdc   : > { %v331_v36 = vpop.f32.mrf.mxu0 }
  0xdd   : > { %v332_v45 = vadd.f32 %v331_v36, %v214_v35 }
  0xdf   : > { %v353_v55 = vmax.f32 %v332_v45, 0.0  ;;  %v436_v59 = vpop.permute.xlu2 %435 }
  0xe4   : > { %v334_v38 = vpop.f32.mrf.mxu0 }
  0xe5   : > { %v335_v43 = vadd.f32 %v334_v38, %v219_v32  ;;  %v508_v38 = vld [vmem:[%s1190_s2 + $0x12] sm:$0x1] }
  0xe6   : > { %599 = vrot.lane.b32.xlu0 %v508_v38, %s915_s29  ;;  %s172_s29 = sand.u32 1, %s905_s13  }
  0xe7   : > { %v354_v53 = vmax.f32 %v335_v43, 0.0  ;;  %s173_s25 = scalar_lea.vmem [#allocation2], %s172_s29  ;;  %s651_s30 = scalar_lea.sflag [#allocation3], %s172_s29 }
  0xe8   : > { %s661_s26 = sshll.u32 %s173_s25, 4  ;;  %s662_s26 = int_to_ptr.vmem [resolvable:$true] %s661_s26 }
  0xec   : > { %v337_v41 = vpop.f32.mrf.mxu0 }
  0xed   : > { %v338_v44 = vadd.f32 %v337_v41, %v224_v37  ;;  %v847_v37 = vpop.permute.xlu1 %846 }
  0xee   : > { %v849_v41 = vunpack.i.h.bf16 %v847_v37  ;;  %v848_v42 = vunpack.i.l.bf16 %v847_v37 }
  0xef   : > { %v355_v47 = vmax.f32 %v338_v44, 0.0  ;;  %v560_v44 = vpop.permute.xlu0 %559 }
  0xf0   : > { %619 = vmatpush.msra.mxu3 %v848_v42 }
  0xf1   : > { %409 = vmatpush.msra.mxu1 %v355_v47 }
  0xf2   : > { %620 = vmatpush.msra.mxu3 %v849_v41 }
  0xf3   : > { %410 = vmatpush.msra.mxu1 %v354_v53 }
  0xf4   : > { %v340_v10 = vpop.f32.mrf.mxu0 }
  0xf5   : > { %411 = vmatpush.msra.mxu1 %v353_v55  ;;  %v341_v31 = vadd.f32 %v340_v10, %v229_v15  ;;  %v440_v54 = vpop.permute.xlu1 %439 }
  0xf7   : > { %412 = vmatpush.msra.mxu1 %v352_v57  ;;  %v444_v53 = vpop.permute.xlu0 %443 }
  0xf8   : > { %757 = vmatmul.msk.f32.vlgmr.msra.gmra.mxu1 %vm388_vm2, %v381_v58 }
  0xfc   : > { %v343_v13 = vpop.f32.mrf.mxu0 }
  0xfd   : > { %v344_v28 = vadd.f32 %v343_v13, %v234_v3 }
 0x100   : > { %758 = vmatmul.msk.f32.gmra.mxu1 %vm388_vm2, %v383_v39 }
 0x104   : > { %v346_v17 = vpop.f32.mrf.mxu0 }
 0x105   : > { %v347_v24 = vadd.f32 %v346_v17, %v239_v14 }
 0x108   : > { %759 = vmatmul.msk.f32.gmra.mxu1 %vm388_vm2, %v385_v61 }
 0x10c   : > { %v349_v21 = vpop.f32.mrf.mxu0 }
 0x10d   : > { %v350_v27 = vadd.f32 %v349_v21, %v244_v9 }
 0x110   : > { %760 = vmatmul.msk.f32.gmra.mxu1 %vm388_vm2, %v387_v40 }
 0x111   : > { %v542_v63 = vpop.f32.mrf.mxu3 }
 0x112   : > { %v543_v0 = vadd.f32 %v542_v63, %v519_v62 }
 0x114   : > { %v545_v1 = vmax.f32 %v543_v0, 0.0 }
 0x116   : > { %766 = vmatmul.msk.f32.vlgmr.msrb.gmra.mxu3 %vm388_vm2, %v545_v1 }
 0x158   : > { %v600_v63 = vpop.permute.xlu0 %599 }
 0x175   : > { %v414_v12 = vpop.f32.mrf.mxu1 }
 0x176   : > { %v415_v32 = vadd.f32 %v414_v12, %v363_v4 }
 0x178   : > { %v426_v40 = vadd.f32 %v415_v32, %v341_v31 }
 0x17a   : > { %v430_v46 = vmax.f32 %v426_v40, 0.0 }
 0x17d   : > { %v417_v16 = vpop.f32.mrf.mxu1 }
 0x17e   : > { %v418_v29 = vadd.f32 %v417_v16, %v368_v18 }
 0x180   : > { %v427_v36 = vadd.f32 %v418_v29, %v344_v28 }
 0x182   : > { %v431_v43 = vmax.f32 %v427_v36, 0.0 }
 0x185   : > { %v420_v20 = vpop.f32.mrf.mxu1 }
 0x186   : > { %v421_v23 = vadd.f32 %v420_v20, %v373_v11 }
 0x188   : > { %v428_v34 = vadd.f32 %v421_v23, %v347_v24 }
 0x18a   : > { %v432_v39 = vmax.f32 %v428_v34, 0.0 }
 0x18d   : > { %v423_v26 = vpop.f32.mrf.mxu1 }
 0x18e   : > { %v424_v30 = vadd.f32 %v423_v26, %v378_v2 }
 0x190   : > { %v429_v33 = vadd.f32 %v424_v30, %v350_v27 }
 0x192   : > { %v433_v35 = vmax.f32 %v429_v33, 0.0 }
 0x194   : > { %478 = vmatpush.msra.mxu2 %v433_v35 }
 0x196   : > { %479 = vmatpush.msra.mxu2 %v432_v39 }
 0x198   : > { %480 = vmatpush.msra.mxu2 %v431_v43 }
 0x199   : > { %v582_v45 = vpop.f32.mrf.mxu3 }
 0x19a   : > { %v583_v47 = vadd.f32 %v582_v45, %v560_v44  ;;  %481 = vmatpush.msra.mxu2 %v430_v46 }
 0x19b   : > { %761 = vmatmul.msk.f32.vlgmr.msra.gmra.mxu2 %vm388_vm2, %v451_v19 }
 0x19c   : > { %v585_v48 = vmax.f32 %v583_v47, 0.0 }
 0x19e   : > { %767 = vmatmul.msk.f32.vlgmr.msra.gmra.mxu3 %vm388_vm2, %v585_v48 }
 0x1a3   : > { %762 = vmatmul.msk.f32.gmra.mxu2 %vm388_vm2, %v453_v5 }
 0x1ab   : > { %763 = vmatmul.msk.f32.gmra.mxu2 %vm388_vm2, %v455_v25 }
 0x1b3   : > { %764 = vmatmul.msk.f32.gmra.mxu2 %vm388_vm2, %v457_v22 }
 0x21e   : > { %v483_v49 = vpop.f32.mrf.mxu2 }
 0x21f   : > { %v484_v60 = vadd.f32 %v483_v49, %v436_v59 }
 0x221   : > { %v622_v0 = vpop.f32.mrf.mxu3  ;;  %v495_v4 = vadd.f32 %v484_v60, %v341_v31 }
 0x222   : > { %v623_v3 = vadd.f32 %v622_v0, %v600_v63 }
 0x223   : > { %v499_v8 = vmax.f32 %v495_v4, 0.0 }
 0x224   : > { %v625_v7 = vmax.f32 %v623_v3, 0.0 }
 0x226   : > { %v486_v50 = vpop.f32.mrf.mxu2 }
 0x227   : > { %v487_v57 = vadd.f32 %v486_v50, %v440_v54 }
 0x229   : > { %v496_v1 = vadd.f32 %v487_v57, %v344_v28 }
 0x22b   : > { %v500_v6 = vmax.f32 %v496_v1, 0.0 }
 0x22e   : > { %v489_v52 = vpop.f32.mrf.mxu2 }
 0x22f   : > { %v490_v55 = vadd.f32 %v489_v52, %v444_v53 }
 0x231   : > { %v497_v61 = vadd.f32 %v490_v55, %v347_v24 }
 0x233   : > { %v501_v5 = vmax.f32 %v497_v61, 0.0 }
 0x236   : > { %v492_v56 = vpop.f32.mrf.mxu2 }
 0x237   : > { %v493_v58 = vadd.f32 %v492_v56, %v448_v51 }
 0x239   : > { %v498_v62 = vadd.f32 %v493_v58, %v350_v27 }
 0x23b   : > { %v502_v2 = vmax.f32 %v498_v62, 0.0 }
 0x23d   : > { %641 = vmatpush.msrb.mxu3 %v502_v2 }
 0x23f   : > { %642 = vmatpush.msrb.mxu3 %v501_v5 }
 0x241   : > { %643 = vmatpush.msrb.mxu3 %v500_v6 }
 0x243   : > { %644 = vmatpush.msrb.mxu3 %v499_v8 }
 0x244   : > { %768 = vmatmul.msk.f32.vlgmr.msrb.gmra.mxu3 %vm388_vm2, %v625_v7 }
 0x2c7   : > { %v646_v9 = vpop.f32.mrf.mxu3 }
 0x2c8   : > { %649 = vst [vmem:[%s173_s25] sm:$0x1] %v646_v9 }
 0x2c9   : > { %878 = shalt.err (!%p875_p3)
}
 0x2ca   : > { %772 = dma.vmem_to_hbm [thread:$0]  (%p978_p5), %s662_s26, 16, %s664_s27, %s651_s30  }
 0x2cb PF: > { %p778_p4 = scmp.ge.s32.totalorder %s913_s15, 2  ;;  %s675_s28 = sand.u32 1, %s901_s12  }
 0x2cc   : > { %s676_s10 = scalar_lea.sflag [#allocation3], %s675_s28 }
 0x2cd   : > { %p775_p7 = pnand %p778_p4, %p982_p6 }
 0x2cf   : > { %p776_p8 = pneg %p775_p7 }
 0x2d1   : > { %896 = dma.done.wait (%p776_p8), %s676_s10, 16  }
 0x2d2   : > { %898 = vsyncadd (%p776_p8), %s676_s10, 4294967280  ;;  %p13_p9 = scmp.ge.s32.totalorder %s965_s18, 4   ;;  %s1194_s12 = smov %s905_s13 }
 0x2d3   : > { %s1195_s13 = smov %s909_s14  ;;  %s1196_s14 = smov %s976_s21 }
 0x2d4   : > { %s1197_s15 = smov %s965_s18  ;;  %15 = sbr.rel (!%p13_p9) target bundleno = 3 (0x3), region = 70 }
 0x2d9   :  { %681 = vsyncpa [#allocation3], 1 }
 0x2da   :  { %683 = vsyncpa [#allocation3 + $0x1], 1 }

</bundles_post_ra>
